<compile_context>
chip_gen: v7x
topology: tpu7x:2x2x1
jax: 0.10.0
libtpu: 0.0.40
codegen_flags: <defaults>
</compile_context>

<pallas_src>
import jax
import jax.numpy as jnp
from jax.experimental import pallas as pl
from jax.experimental.pallas import tpu as pltpu


# ----------------------------- Pallas kernel ------------------------------- #

def _fused_seghead_kernel(x_ref, w1_ref, b1_ref, w2_ref, b2_ref, up_ref, o_ref):
    """Per-image fused head + bilinear upsample.

    x_ref : (1, C, H*W)        pixels on lanes, channels on sublanes
    w1_ref: (C, C)             conv1 weight (BN folded), channel-major
    b1_ref: (C, 1)             conv1 bias (BN folded)
    w2_ref: (K, C)             conv2 weight, channel-major
    b2_ref: (K, 1)             conv2 bias
    up_ref: (H*W, Ho*Wo)       kron(Wy, Wx)^T  (align_corners=True bilinear)
    o_ref : (1, K, Ho*Wo)      lane-dense output
    """
    x = x_ref[0]                                                       # (C, HW)
    y = jnp.dot(w1_ref[...], x, preferred_element_type=jnp.float32) + b1_ref[...]
    y = jnp.maximum(y, 0.0)                                            # ReLU
    l = jnp.dot(w2_ref[...], y, preferred_element_type=jnp.float32) + b2_ref[...]
    o = jnp.dot(l, up_ref[...], preferred_element_type=jnp.float32)    # (K, Ho*Wo)
    o_ref[0] = o.astype(o_ref.dtype)


# ------------------------------ JAX glue ----------------------------------- #

def bilinear_matrix(out_size, in_size):
    """Interpolation matrix for nn.UpsamplingBilinear2d (align_corners=True)."""
    if out_size == 1:
        src = jnp.zeros((1,), jnp.float32)
    else:
        src = jnp.arange(out_size, dtype=jnp.float32) * (in_size - 1) / (out_size - 1)
    i0 = jnp.clip(jnp.floor(src).astype(jnp.int32), 0, in_size - 1)
    i1 = jnp.clip(i0 + 1, 0, in_size - 1)
    frac = src - i0.astype(jnp.float32)
    m = (jax.nn.one_hot(i0, in_size, dtype=jnp.float32) * (1.0 - frac)[:, None]
         + jax.nn.one_hot(i1, in_size, dtype=jnp.float32) * frac[:, None])
    return m


def seghead_forward(x_nchw, out_size, params):
    """Eval-mode Seghead.forward: returns blob_pred (N, num_classes, Ho, Wo)."""
    N, C, H, W = x_nchw.shape
    Ho, Wo = out_size
    K = params["w2"].shape[1]
    HW, HoWo = H * W, Ho * Wo

    # Fold eval BatchNorm into conv1; transpose weights so channels contract on
    # the sublane axis while pixels stay on lanes.
    bn_scale = params["bn_scale"].reshape(-1)                 # (C,)
    bn_shift = params["bn_shift"].reshape(-1)                 # (C,)
    w1_eff = (params["w1"] * bn_scale[None, :]).T             # (C, C)   [out, in]
    b1_eff = (params["b1"].reshape(-1) * bn_scale + bn_shift).reshape(C, 1)
    w2_eff = params["w2"].T                                   # (K, C)
    b2_eff = params["b2"].reshape(K, 1)

    # Precompute the separable bilinear upsample as a single matrix:
    # O[k, ho*Wo+wo] = sum_{h,w} Wy[ho,h] * Wx[wo,w] * L[k, h*W+w]
    wy = bilinear_matrix(Ho, H)                               # (Ho, H)
    wx = bilinear_matrix(Wo, W)                               # (Wo, W)
    up = jnp.kron(wy, wx).T                                   # (H*W, Ho*Wo)

    x3 = x_nchw.reshape(N, C, HW)                             # contiguous reshape

    out = pl.pallas_call(
        _fused_seghead_kernel,
        out_shape=jax.ShapeDtypeStruct((N, K, HoWo), jnp.float32),
        grid=(N,),
        in_specs=[
            pl.BlockSpec((1, C, HW), lambda n: (n, 0, 0)),    # per-image features
            pl.BlockSpec((C, C), lambda n: (0, 0)),           # W1 (BN folded)
            pl.BlockSpec((C, 1), lambda n: (0, 0)),           # b1 (BN folded)
            pl.BlockSpec((K, C), lambda n: (0, 0)),           # W2
            pl.BlockSpec((K, 1), lambda n: (0, 0)),           # b2
            pl.BlockSpec((HW, HoWo), lambda n: (0, 0)),       # bilinear matrix
        ],
        out_specs=pl.BlockSpec((1, K, HoWo), lambda n: (n, 0, 0)),
        compiler_params=pltpu.CompilerParams(
            dimension_semantics=("parallel",)),
    )(x3, w1_eff, b1_eff, w2_eff, b2_eff, up)

    return out.reshape(N, K, Ho, Wo)


def reference_forward(x_nchw, out_size, params):
    """Pure-JAX reference of the same semantics (for a correctness check)."""
    x = jnp.transpose(x_nchw, (0, 2, 3, 1))                   # (N,H,W,C)
    y = x @ params["w1"] + params["b1"][0]
    y = y * params["bn_scale"][0] + params["bn_shift"][0]
    y = jnp.maximum(y, 0.0)
    y = y @ params["w2"] + params["b2"][0]                    # (N,H,W,K)
    wy = bilinear_matrix(out_size[0], x.shape[1])
    wx = bilinear_matrix(out_size[1], x.shape[2])
    return jnp.einsum("nhwc,oh,pw->ncop", y, wy, wx)


# -------------------------------- main -------------------------------------- #

if __name__ == "__main__":
    # inplanes = (4, 8, 8, 12) -> last_inp_channels = 32 ; num_classes = 19
    inplanes = (4, 8, 8, 12)
    cin = int(sum(inplanes))
    num_classes = 19
    N, H, W = 2, 16, 16
    out_size = (32, 32)            # input['size']
    eps = 1e-5

    key = jax.random.PRNGKey(0)
    ks = jax.random.split(key, 9)

    # Deterministic synthetic parameters (1x1 conv weights stored as (Cin, Cout)).
    w1 = (0.05 * jax.random.normal(ks[0], (cin, cin))).astype(jnp.float32)
    b1 = (0.10 * jax.random.normal(ks[1], (1, cin))).astype(jnp.float32)
    gamma = (1.0 + 0.1 * jax.random.normal(ks[2], (cin,))).astype(jnp.float32)
    beta = (0.1 * jax.random.normal(ks[3], (cin,))).astype(jnp.float32)
    running_mean = (0.1 * jax.random.normal(ks[4], (cin,))).astype(jnp.float32)
    running_var = (1.0 + jax.random.uniform(ks[5], (cin,))).astype(jnp.float32)
    w2 = (0.05 * jax.random.normal(ks[6], (cin, num_classes))).astype(jnp.float32)
    b2 = (0.10 * jax.random.normal(ks[7], (1, num_classes))).astype(jnp.float32)

    # Eval-mode BatchNorm as per-channel affine (folded into conv1 inside
    # seghead_forward; kept separate here so the reference can use it too).
    bn_scale = (gamma / jnp.sqrt(running_var + eps)).reshape(1, cin)
    bn_shift = (beta - running_mean * gamma / jnp.sqrt(running_var + eps)).reshape(1, cin)

    params = dict(w1=w1, b1=b1, bn_scale=bn_scale, bn_shift=bn_shift, w2=w2, b2=b2)

    # input['features'] in NCHW, like PyTorch.
    features = jax.random.normal(ks[8], (N, cin, H, W), dtype=jnp.float32)

    # TODO(synk): training-mode loss branch (build_loss / gt_semantic_seg) not
    # implemented; only the inference path ('blob_pred') is reproduced.
    out = seghead_forward(features, out_size, params)
    out = jax.block_until_ready(out)

    ref = reference_forward(features, out_size, params)
    assert out.shape == (N, num_classes, out_size[0], out_size[1]), out.shape
    assert jnp.allclose(out, ref, rtol=1e-4, atol=1e-4), float(jnp.max(jnp.abs(out - ref)))

    print("KERNEL_OK")
</pallas_src>

<mosaic_0001>
module attributes {stable_mosaic.version = 11 : i64} {
  func.func @_fused_seghead_kernel(%arg0: i32, %arg1: memref<1x32x256xf32, #tpu.memory_space<vmem>>, %arg2: memref<32x32xf32, #tpu.memory_space<vmem>>, %arg3: memref<32x1xf32, #tpu.memory_space<vmem>>, %arg4: memref<19x32xf32, #tpu.memory_space<vmem>>, %arg5: memref<19x1xf32, #tpu.memory_space<vmem>>, %arg6: memref<256x1024xf32, #tpu.memory_space<vmem>>, %arg7: memref<1x19x1024xf32, #tpu.memory_space<vmem>>) attributes {dimension_semantics = [#tpu.dimension_semantics<parallel>], iteration_bounds = array<i64: 2>, scalar_prefetch = 0 : i64, scratch_operands = 0 : i64, tpu.core_type = #tpu.core_type<tc>, window_params = [{transform_indices = @transform_0, window_bounds = array<i64: 1, 32, 256>}, {pipeline_mode = #tpu.pipeline_mode<synchronous>, transform_indices = @transform_1, window_bounds = array<i64: 32, 32>}, {pipeline_mode = #tpu.pipeline_mode<synchronous>, transform_indices = @transform_2, window_bounds = array<i64: 32, 1>}, {pipeline_mode = #tpu.pipeline_mode<synchronous>, transform_indices = @transform_3, window_bounds = array<i64: 19, 32>}, {pipeline_mode = #tpu.pipeline_mode<synchronous>, transform_indices = @transform_4, window_bounds = array<i64: 19, 1>}, {pipeline_mode = #tpu.pipeline_mode<synchronous>, transform_indices = @transform_5, window_bounds = array<i64: 256, 1024>}, {transform_indices = @transform_6, window_bounds = array<i64: 1, 19, 1024>}]} {
    %c0 = arith.constant 0 : index
    %c0_0 = arith.constant 0 : index
    %c0_1 = arith.constant 0 : index
    %0 = vector.load %arg1[%c0, %c0_0, %c0_1] : memref<1x32x256xf32, #tpu.memory_space<vmem>>, vector<1x32x256xf32>
    %1 = vector.shape_cast %0 : vector<1x32x256xf32> to vector<32x256xf32>
    %c0_2 = arith.constant 0 : index
    %c0_3 = arith.constant 0 : index
    %2 = vector.load %arg2[%c0_2, %c0_3] : memref<32x32xf32, #tpu.memory_space<vmem>>, vector<32x32xf32>
    %cst = arith.constant dense<0.000000e+00> : vector<32x256xf32>
    %3 = tpu.matmul %2, %1, %cst {dimension_numbers = #tpu.dot_dimension_numbers<[1], [0], [0], [1], [0, 0, 1, 1], [], []>} : vector<32x32xf32>, vector<32x256xf32>, vector<32x256xf32> -> vector<32x256xf32>
    %c0_4 = arith.constant 0 : index
    %c0_5 = arith.constant 0 : index
    %4 = vector.load %arg3[%c0_4, %c0_5] : memref<32x1xf32, #tpu.memory_space<vmem>>, vector<32x1xf32>
    %5 = vector.broadcast %4 : vector<32x1xf32> to vector<32x256xf32>
    %6 = arith.addf %3, %5 : vector<32x256xf32>
    %cst_6 = arith.constant 0.000000e+00 : f32
    %7 = vector.broadcast %cst_6 : f32 to vector<32x256xf32>
    %8 = arith.maximumf %6, %7 : vector<32x256xf32>
    %c0_7 = arith.constant 0 : index
    %c0_8 = arith.constant 0 : index
    %9 = vector.load %arg4[%c0_7, %c0_8] : memref<19x32xf32, #tpu.memory_space<vmem>>, vector<19x32xf32>
    %cst_9 = arith.constant dense<0.000000e+00> : vector<19x256xf32>
    %10 = tpu.matmul %9, %8, %cst_9 {dimension_numbers = #tpu.dot_dimension_numbers<[1], [0], [0], [1], [0, 0, 1, 1], [], []>} : vector<19x32xf32>, vector<32x256xf32>, vector<19x256xf32> -> vector<19x256xf32>
    %c0_10 = arith.constant 0 : index
    %c0_11 = arith.constant 0 : index
    %11 = vector.load %arg5[%c0_10, %c0_11] : memref<19x1xf32, #tpu.memory_space<vmem>>, vector<19x1xf32>
    %12 = vector.broadcast %11 : vector<19x1xf32> to vector<19x256xf32>
    %13 = arith.addf %10, %12 : vector<19x256xf32>
    %c0_12 = arith.constant 0 : index
    %c0_13 = arith.constant 0 : index
    %14 = vector.load %arg6[%c0_12, %c0_13] : memref<256x1024xf32, #tpu.memory_space<vmem>>, vector<256x1024xf32>
    %cst_14 = arith.constant dense<0.000000e+00> : vector<19x1024xf32>
    %15 = tpu.matmul %13, %14, %cst_14 {dimension_numbers = #tpu.dot_dimension_numbers<[1], [0], [0], [1], [0, 0, 1, 1], [], []>} : vector<19x256xf32>, vector<256x1024xf32>, vector<19x1024xf32> -> vector<19x1024xf32>
    %c0_15 = arith.constant 0 : index
    %c0_16 = arith.constant 0 : index
    %c0_17 = arith.constant 0 : index
    %16 = vector.load %arg7[%c0_15, %c0_16, %c0_17] : memref<1x19x1024xf32, #tpu.memory_space<vmem>>, vector<1x19x1024xf32>
    %17 = vector.shape_cast %16 : vector<1x19x1024xf32> to vector<19x1024xf32>
    %18 = vector.shape_cast %15 : vector<19x1024xf32> to vector<1x19x1024xf32>
    tpu.vector_store %arg7[%c0_15, %c0_16, %c0_17], %18 {strides = array<i32>} : memref<1x19x1024xf32, #tpu.memory_space<vmem>>, vector<1x19x1024xf32>,
    return
  }
  func.func @transform_0(%arg0: i32) -> (i32, i32, i32) {
    %c0_i32 = arith.constant 0 : i32
    %c0_i32_0 = arith.constant 0 : i32
    %c0_i32_1 = arith.constant 0 : i32
    return %arg0, %c0_i32, %c0_i32_0 : i32, i32, i32
  }
  func.func @transform_1(%arg0: i32) -> (i32, i32) {
    %c0_i32 = arith.constant 0 : i32
    %c0_i32_0 = arith.constant 0 : i32
    %c0_i32_1 = arith.constant 0 : i32
    return %c0_i32, %c0_i32_0 : i32, i32
  }
  func.func @transform_2(%arg0: i32) -> (i32, i32) {
    %c0_i32 = arith.constant 0 : i32
    %c0_i32_0 = arith.constant 0 : i32
    %c0_i32_1 = arith.constant 0 : i32
    return %c0_i32, %c0_i32_0 : i32, i32
  }
  func.func @transform_3(%arg0: i32) -> (i32, i32) {
    %c0_i32 = arith.constant 0 : i32
    %c0_i32_0 = arith.constant 0 : i32
    %c0_i32_1 = arith.constant 0 : i32
    return %c0_i32, %c0_i32_0 : i32, i32
  }
  func.func @transform_4(%arg0: i32) -> (i32, i32) {
    %c0_i32 = arith.constant 0 : i32
    %c0_i32_0 = arith.constant 0 : i32
    %c0_i32_1 = arith.constant 0 : i32
    return %c0_i32, %c0_i32_0 : i32, i32
  }
  func.func @transform_5(%arg0: i32) -> (i32, i32) {
    %c0_i32 = arith.constant 0 : i32
    %c0_i32_0 = arith.constant 0 : i32
    %c0_i32_1 = arith.constant 0 : i32
    return %c0_i32, %c0_i32_0 : i32, i32
  }
  func.func @transform_6(%arg0: i32) -> (i32, i32, i32) {
    %c0_i32 = arith.constant 0 : i32
    %c0_i32_0 = arith.constant 0 : i32
    %c0_i32_1 = arith.constant 0 : i32
    return %arg0, %c0_i32, %c0_i32_0 : i32, i32, i32
  }
}

</mosaic_0001>

<bundles_post_ra>
// kernel: tpu_custom_call.1
= control target key start
LH: loop header
LB: loop body
LE: loop exit
PB: predicated region body
PF: predicated region fallthrough
CT: control target
= control target key end

     0   :  { %11 = vsyncpa [#allocation3], 0  ;;  %s1988_s0 = inlined_call_operand.hbm [shape: f32[2,32,256], index: 0, kind: input, shape index: {}]   ;;  %s1989_s1 = inlined_call_operand.vmem [shape: f32[32,32], index: 1, kind: input, shape index: {}]   ;;  %s1990_s2 = inlined_call_operand.vmem [shape: f32[32,1], index: 2, kind: input, shape index: {}]   ;;  %s1991_s3 = inlined_call_operand.vmem [shape: f32[19,32], index: 3, kind: input, shape index: {}]   ;;  %s1992_s4 = inlined_call_operand.vmem [shape: f32[19,1], index: 4, kind: input, shape index: {}]   ;;  %s1993_s5 = inlined_call_operand.hbm [shape: f32[256,1024], index: 5, kind: input, shape index: {}]   ;;  %s1994_s6 = inlined_call_operand.vmem [shape: f32[2,19,1024], index: 6, kind: output, shape index: {}]  }
   0x1   :  { %13 = vsyncpa [#allocation3 + $0x1], 0 }
   0x2   :  { %14 = vsyncpa [#allocation5], 0  ;;  %s1728_s21 = smov 0   ;;  %s1730_s22 = smov 0  }
   0x3   :  { %s1732_s23 = smov 0   ;;  %s1734_s24 = smov 0  }
   0x4 LB: > { %s1747_s25 = sadd.s32 4294967295, %s1683_s24   ;;  %p40_p0 = scmp.ne.s32.totalorder %s1675_s22, %s1671_s21  ;;  %s1683_s24 = sphi %s1734_s24, %s2009_s24   ;;  %s1679_s23 = sphi %s1732_s23, %s2008_s23   ;;  %s1675_s22 = sphi %s1730_s22, %s2007_s22   ;;  %s1671_s21 = sphi %s1728_s21, %s2006_s21  }
   0x5   : > { %p1995_p1 = scmp.eq.s32.totalorder %s1747_s25, 0  ;;  %p1236_p2 = scmp.ge.s32.totalorder %s1683_s24, 1 }
   0x6   : > { %p182_p3 = scmp.lt.s32.totalorder %s1683_s24, 3  ;;  %s1685_s28 = smov [#allocation4]  }
   0x7   : > { %p1755_p4 = por %p1995_p1, %p40_p0  ;;  %s206_s29 = sshll.u32 %s1685_s28, 4  ;;  %s207_s29 = int_to_ptr.vmem [resolvable:$true] %s206_s29 }
   0x8   : > { %p1759_p5 = pnand %p1236_p2, %p182_p3  ;;  %s1772_s7 = sadd.s32 1, %s1683_s24  }
   0x9   : > { %s1998_s26 = scalar_select %p1755_p4, 1, 0 }
   0xa   : > { %s1999_s27 = scalar_select %p1759_p5, 1, 0 }
   0xb   : > { %p1535_p6 = pneg %p1759_p5  ;;  %s27_s8 = sadd.s32 1, %s1679_s23 }
   0xc   : > { %s24_s9 = ssub.s32 %s1683_s24, %s1772_s7  ;;  %s1587_s12 = scalar_lea.hbm %s1993_s5, 32768 }
   0xd   : > { %p1767_p7 = pnand %p1535_p6, %p1995_p1  ;;  %p1588_p8 = scmp.ne.s32.totalorder %s1993_s5, %s1587_s12 }
   0xe   : > { %p1594_p12 = scmp.lt.u32.totalorder %s1587_s12, %s1993_s5 }
   0xf   : > { %p1589_p9 = pneg %p1767_p7 }
  0x11   : > { %p1590_p10 = pnand %p1589_p9, %p1588_p8 }
  0x13   : > { %p1591_p11 = pneg %p1590_p10 }
  0x15   : > { %p1596_p13 = pnand %p1594_p12, %p1591_p11 }
  0x17   : > { %1599 = shalt.err (!%p1596_p13)
}
  0x18   : > { %s1600_s17 = scalar_lea.vmem %s207_s29, 32768  ;;  %p1608_p6 = scmp.lt.s32.totalorder %s207_s29, %s207_s29 }
  0x19   : > { %p1601_p0 = scmp.ne.s32.totalorder %s207_s29, %s1600_s17  ;;  %p1609_p1 = scmp.lt.s32.totalorder %s1600_s17, %s1600_s17 }
  0x1b   : > { %p1603_p2 = pnand %p1601_p0, %p1589_p9  ;;  %p1610_p4 = por %p1609_p1, %p1608_p6 }
  0x1d   : > { %p1604_p3 = pneg %p1603_p2 }
  0x1f   : > { %p1611_p5 = pnand %p1610_p4, %p1604_p3 }
  0x21   : > { %1614 = shalt.err (!%p1611_p5)
}
  0x22   : > { %s1686_s18 = smov 1024   ;;  %s1687_s19 = smov 64  }
  0x23   : > { %1538 = dma.hbm_to_vmem [thread:$0]  (!%p1767_p7), %s1993_s5, 32768, %s207_s29, [#allocation5], %s1686_s18, %s1686_s18, %s1687_s19  }
  0x24   : > { %p25_p8 = scmp.eq.s32.totalorder %s24_s9, 0  ;;  %p34_p9 = scmp.ne.s32.totalorder %s1679_s23, %s1675_s22 }
  0x25   : > { %p35_p1 = scmp.eq.s32.totalorder %s1683_s24, 0  ;;  %p1544_p4 = scmp.lt.s32.totalorder %s1683_s24, 2 }
  0x26   : > { %s1798_s28 = scalar_select %p25_p8, %s1679_s23, %s27_s8  }
  0x27   : > { %p36_p5 = por %p35_p1, %p34_p9  ;;  %s220_s10 = sand.u32 1, %s1679_s23  }
  0x28   : > { %s1239_s11 = sshll.u32 %s220_s10, 6  ;;  %s1255_s12 = sshll.u32 %s1683_s24, 10 }
  0x29   : > { %s1805_s15 = scalar_lea.hbm %s1988_s0, %s1255_s12  ;;  %s224_s29 = scalar_lea.vmem [#allocation2], %s1239_s11 }
  0x2a   : > { %s231_s30 = sshll.u32 %s224_s29, 4  ;;  %p1809_p7 = pnand %p1544_p4, %p36_p5  ;;  %s1807_s30 = int_to_ptr.vmem [resolvable:$true] %s231_s30 }
  0x2b   : > { %s1813_s24 = scalar_lea.sflag [#allocation3], %s220_s10  ;;  %s1615_s9 = scalar_lea.hbm %s1805_s15, 1024 }
  0x2c   : > { %p1616_p10 = scmp.ne.s32.totalorder %s1805_s15, %s1615_s9  ;;  %p1617_p11 = pneg %p1809_p7 }
  0x2d   : > { %s1620_s18 = scalar_lea.hbm %s1988_s0, 2048  ;;  %p1621_p0 = scmp.lt.u32.totalorder %s1805_s15, %s1988_s0 }
  0x2e   : > { %p1618_p12 = pnand %p1617_p11, %p1616_p10  ;;  %p1622_p2 = scmp.lt.u32.totalorder %s1620_s18, %s1615_s9 }
  0x2f   : > { %p1624_p6 = scmp.lt.u32.totalorder %s1615_s9, %s1805_s15 }
  0x30   : > { %p1619_p13 = pneg %p1618_p12  ;;  %p1623_p3 = por %p1622_p2, %p1621_p0 }
  0x32   : > { %p1625_p8 = por %p1624_p6, %p1623_p3 }
  0x34   : > { %p1626_p9 = pnand %p1625_p8, %p1619_p13 }
  0x36   : > { %1629 = shalt.err (!%p1626_p9)
}
  0x37   : > { %s1630_s21 = scalar_lea.vmem %s1807_s30, 1024  ;;  %s1688_s10 = smov [#allocation2]  }
  0x38   : > { %p1631_p1 = scmp.ne.s32.totalorder %s1807_s30, %s1630_s21  ;;  %s1635_s11 = sshll.u32 %s1688_s10, 4  ;;  %s1636_s11 = int_to_ptr.vmem [resolvable:$false] %s1635_s11 }
  0x39   : > { %s1637_s12 = scalar_lea.vmem %s1636_s11, 2048  ;;  %p1638_p10 = scmp.lt.s32.totalorder %s1807_s30, %s1636_s11 }
  0x3a   : > { %p1633_p4 = pnand %p1631_p1, %p1617_p11  ;;  %p1639_p12 = scmp.lt.s32.totalorder %s1637_s12, %s1630_s21 }
  0x3c   : > { %p1634_p5 = pneg %p1633_p4  ;;  %p1640_p0 = por %p1639_p12, %p1638_p10 }
  0x3e   : > { %p1641_p2 = pnand %p1640_p0, %p1634_p5 }
  0x40   : > { %1644 = shalt.err (!%p1641_p2)
}
  0x41   : > { %s1689_s13 = smov 256   ;;  %s1690_s14 = smov 16  }
  0x42   : > { %1542 = dma.hbm_to_vmem [thread:$0]  (!%p1809_p7), %s1805_s15, 1024, %s1807_s30, %s1813_s24, %s1689_s13, %s1689_s13, %s1690_s14  }
  0x43   : > { %p2002_p11 = scmp.ne.s32.totalorder %s1999_s27, 0 }
  0x44   : > { %s245_s29 = sand.u32 (!%p2002_p11), 1, %s1675_s22   ;;  %p2003_p13 = scmp.ne.s32.totalorder (!%p2002_p11), %s1998_s26, 0 }
  0x45   : > { %243 = sbr.rel (%p2002_p11) target bundleno = 828 (0x33c), region = 44  ;;  %s1243_s9 = sshll.u32 (!%p2002_p11), %s245_s29, 6 }
  0x46   : > { %s246_s16 = scalar_lea.sflag (!%p2002_p11), [#allocation3], %s245_s29  ;;  %s249_s17 = scalar_lea.vmem (!%p2002_p11), [#allocation2], %s1243_s9 }
  0x4c   : > { %1662 = dma.done.wait (%p2003_p13), %s246_s16, 1024  }
  0x4d   : > { %1664 = vsyncadd (%p2003_p13), %s246_s16, 4294966272  ;;  %p2004_p3 = scmp.eq.s32.totalorder %s1747_s25, 0 }
  0x4f   : > { %1666 = dma.done.wait (%p2004_p3), [#allocation5], 32768   ;;  %p2005_p6 = pmov %p2004_p3 }
  0x50   : > { %v1691_v0 = vmov 0.0   ;;  %v1692_v1 = vmov 0   ;;  %v288_v2 = vld [vmem:[%s249_s17 + $0x8] sm:$0xff]  ;;  %v290_v3 = vld [vmem:[%s249_s17 + $0x18] sm:$0xff]  ;;  %v287_v4 = vld [vmem:[%s249_s17] sm:$0xff]  ;;  %vm323_vm0 = vcmask 261120  }
  0x51   : > { %1668 = vsyncadd (%p2005_p6), [#allocation5], 4294934528  ;;  %400 = vmatprep.mubr.f32.mxu0 %v1691_v0  ;;  %1585 = vset.pattern.permute.xlu0 %v1692_v1  ;;  %v1256_v5 = vpack.c.bf16 %v290_v3, %v288_v2  ;;  %v289_v6 = vld [vmem:[%s249_s17 + $0x10] sm:$0xff]  ;;  %v292_v7 = vld [vmem:[%s249_s17 + $0x28] sm:$0xff]  ;;  %p282_p7 = scmp.lt.s32.totalorder %s1747_s25, 1 }
  0x52   : > { %1586 = vset.pattern.permute.xlu1 %v1692_v1  ;;  %527 = vmatprep.mubr.f32.mxu1 %v1691_v0  ;;  %v294_v8 = vld [vmem:[%s249_s17 + $0x38] sm:$0xff]  ;;  %v1258_v9 = vpack.c.bf16 %v289_v6, %v287_v4  ;;  %v291_v11 = vld [vmem:[%s249_s17 + $0x20] sm:$0xff]  ;;  %v293_v12 = vld [vmem:[%s249_s17 + $0x30] sm:$0xff] }
  0x53   : > { %v1260_v10 = vpack.c.bf16 %v294_v8, %v292_v7  ;;  %1257 = vmatprep.subr.bf16.mxu0 %v1256_v5  ;;  %v1262_v13 = vpack.c.bf16 %v293_v12, %v291_v11  ;;  %v299_v14 = vld [vmem:[%s1990_s2] sm:$0xff]  ;;  %v301_v15 = vld [vmem:[%s1990_s2 + $0x10] sm:$0xff]  ;;  %v300_v16 = vld [vmem:[%s1990_s2 + $0x8] sm:$0xff]  ;;  %s2011_s25 = smov (!%p282_p7, %s1747_s25), 1 }
  0x54   : > { %1259 = vmatpush1.bf16.msra.mxu0 %v1258_v9  ;;  %305 = vperm.xlu0 %1585, %v299_v14   ;;  %v302_v17 = vld [vmem:[%s1990_s2 + $0x18] sm:$0xff]  ;;  %v295_v18 = vld [vmem:[%s1989_s1] sm:$0xff]  ;;  %v437_v20 = vld [vmem:[%s1992_s4 + $0x8] sm:$0xff]  ;;  %s1528_s21 = smul.u32 192, %s2011_s25 }
  0x55   : > { %1261 = vmatprep.subr.bf16.mxu0 %v1260_v10  ;;  %315 = vperm.xlu1 %1586, %v301_v15   ;;  %v436_v19 = vld [vmem:[%s1992_s4] sm:$0xff]  ;;  %v296_v21 = vld [vmem:[%s1989_s1 + $0x8] sm:$0xff]  ;;  %v438_v22 = vld [vmem:[%s1992_s4 + $0x10] sm:$0x7] }
  0x56   : > { %v297_v23 = vld [vmem:[%s1989_s1 + $0x10] sm:$0xff]  ;;  %v298_v24 = vld [vmem:[%s1989_s1 + $0x18] sm:$0xff]  ;;  %v547_v25 = vld [vmem:[#allocation4 + $0x8] sm:$0xff]  ;;  %s1949_s12 = scalar_lea.vmem %s1994_s6, %s1528_s21 }
  0x57   : > { %v555_v26 = vld [vmem:[#allocation4 + $0x48] sm:$0xff]  ;;  %v546_v28 = vld [vmem:[#allocation4] sm:$0xff] }
  0x58   : > { %1263 = vmatpush1.bf16.msra.mxu0 %v1262_v13  ;;  %310 = vperm.xlu0 %1585, %v300_v16   ;;  %v1272_v27 = vpack.c.bf16 %v555_v26, %v547_v25  ;;  %v554_v29 = vld [vmem:[#allocation4 + $0x40] sm:$0xff]  ;;  %v563_v31 = vld [vmem:[#allocation4 + $0x88] sm:$0xff] }
  0x59   : > { %320 = vperm.xlu1 %1586, %v302_v17   ;;  %v1274_v30 = vpack.c.bf16 %v554_v29, %v546_v28  ;;  %v571_v32 = vld [vmem:[#allocation4 + $0xc8] sm:$0xff]  ;;  %v562_v34 = vld [vmem:[#allocation4 + $0x80] sm:$0xff] }
  0x5a   : > { %1273 = vmatprep.subr.bf16.mxu0 %v1272_v27  ;;  %v1276_v33 = vpack.c.bf16 %v571_v32, %v563_v31  ;;  %v570_v35 = vld [vmem:[#allocation4 + $0xc0] sm:$0xff]  ;;  %v579_v37 = vld [vmem:[#allocation4 + $0x108] sm:$0xff] }
  0x5b   : > { %1246 = vmatmul.mubr.msk.f32.vlgmr.msra.gmra.mrb[0].mxu0 %vm323_vm0, %v295_v18  ;;  %v1278_v36 = vpack.c.bf16 %v570_v35, %v562_v34  ;;  %v587_v38 = vld [vmem:[#allocation4 + $0x148] sm:$0xff]  ;;  %v578_v40 = vld [vmem:[#allocation4 + $0x100] sm:$0xff] }
  0x5c   : > { %406 = vmatprep.mubr.f32.mxu0 %v1691_v0  ;;  %441 = vperm.xlu0 %1585, %v436_v19   ;;  %v1280_v39 = vpack.c.bf16 %v587_v38, %v579_v37  ;;  %v586_v41 = vld [vmem:[#allocation4 + $0x140] sm:$0xff]  ;;  %v595_v43 = vld [vmem:[#allocation4 + $0x188] sm:$0xff] }
  0x5d   : > { %446 = vperm.xlu1 %1586, %v437_v20   ;;  %1275 = vmatpush1.bf16.msra.mxu0 %v1274_v30  ;;  %v1282_v42 = vpack.c.bf16 %v586_v41, %v578_v40  ;;  %v603_v44 = vld [vmem:[#allocation4 + $0x1c8] sm:$0xff]  ;;  %v594_v46 = vld [vmem:[#allocation4 + $0x180] sm:$0xff] }
  0x5e   : > { %1277 = vmatprep.subr.bf16.mxu0 %v1276_v33  ;;  %v1284_v45 = vpack.c.bf16 %v603_v44, %v595_v43  ;;  %v602_v47 = vld [vmem:[#allocation4 + $0x1c0] sm:$0xff]  ;;  %v611_v48 = vld [vmem:[#allocation4 + $0x208] sm:$0xff] }
  0x5f   : > { %1247 = vmatmul.mubr.msk.f32.gmra.mrb[2].mxu0 %vm323_vm0, %v296_v21  ;;  %v619_v49 = vld [vmem:[#allocation4 + $0x248] sm:$0xff]  ;;  %v1286_v50 = vpack.c.bf16 %v602_v47, %v594_v46  ;;  %v610_v52 = vld [vmem:[#allocation4 + $0x200] sm:$0xff] }
  0x60   : > { %412 = vmatprep.mubr.f32.mxu0 %v1691_v0  ;;  %451 = vperm.xlu0 %1585, %v438_v22   ;;  %v1288_v51 = vpack.c.bf16 %v619_v49, %v611_v48  ;;  %v618_v53 = vld [vmem:[#allocation4 + $0x240] sm:$0xff]  ;;  %v627_v54 = vld [vmem:[#allocation4 + $0x288] sm:$0xff] }
  0x61   : > { %1279 = vmatpush1.bf16.msra.mxu0 %v1278_v36  ;;  %v635_v55 = vld [vmem:[#allocation4 + $0x2c8] sm:$0xff]  ;;  %v1290_v56 = vpack.c.bf16 %v618_v53, %v610_v52  ;;  %v626_v58 = vld [vmem:[#allocation4 + $0x280] sm:$0xff] }
  0x62   : > { %1281 = vmatprep.subr.bf16.mxu0 %v1280_v39  ;;  %v1292_v57 = vpack.c.bf16 %v635_v55, %v627_v54  ;;  %v634_v59 = vld [vmem:[#allocation4 + $0x2c0] sm:$0xff]  ;;  %v643_v60 = vld [vmem:[#allocation4 + $0x308] sm:$0xff] }
  0x63   : > { %1248 = vmatmul.mubr.msk.f32.gmra.mrb[4].mxu0 %vm323_vm0, %v297_v23  ;;  %v651_v61 = vld [vmem:[#allocation4 + $0x348] sm:$0xff]  ;;  %v1294_v62 = vpack.c.bf16 %v634_v59, %v626_v58  ;;  %v642_v1 = vld [vmem:[#allocation4 + $0x300] sm:$0xff] }
  0x64   : > { %418 = vmatprep.mubr.f32.mxu0 %v1691_v0  ;;  %v1296_v63 = vpack.c.bf16 %v651_v61, %v643_v60  ;;  %v650_v2 = vld [vmem:[#allocation4 + $0x340] sm:$0xff]  ;;  %v659_v3 = vld [vmem:[#allocation4 + $0x388] sm:$0xff] }
  0x65   : > { %1283 = vmatpush1.bf16.msra.mxu0 %v1282_v42  ;;  %v667_v4 = vld [vmem:[#allocation4 + $0x3c8] sm:$0xff]  ;;  %v1298_v5 = vpack.c.bf16 %v650_v2, %v642_v1  ;;  %v658_v7 = vld [vmem:[#allocation4 + $0x380] sm:$0xff] }
  0x66   : > { %1285 = vmatprep.subr.bf16.mxu0 %v1284_v45  ;;  %v1300_v6 = vpack.c.bf16 %v667_v4, %v659_v3  ;;  %v666_v8 = vld [vmem:[#allocation4 + $0x3c0] sm:$0xff]  ;;  %v675_v9 = vld [vmem:[#allocation4 + $0x408] sm:$0xff] }
  0x67   : > { %1249 = vmatmul.mubr.msk.f32.gmra.mrb[6].mxu0 %vm323_vm0, %v298_v24  ;;  %v683_v10 = vld [vmem:[#allocation4 + $0x448] sm:$0xff]  ;;  %v1302_v11 = vpack.c.bf16 %v666_v8, %v658_v7  ;;  %v674_v13 = vld [vmem:[#allocation4 + $0x400] sm:$0xff] }
  0x68   : > { %v1304_v12 = vpack.c.bf16 %v683_v10, %v675_v9  ;;  %v682_v14 = vld [vmem:[#allocation4 + $0x440] sm:$0xff]  ;;  %v691_v15 = vld [vmem:[#allocation4 + $0x488] sm:$0xff] }
  0x69   : > { %1287 = vmatpush1.bf16.msra.mxu0 %v1286_v50  ;;  %v699_v16 = vld [vmem:[#allocation4 + $0x4c8] sm:$0xff]  ;;  %v1306_v17 = vpack.c.bf16 %v682_v14, %v674_v13  ;;  %v690_v19 = vld [vmem:[#allocation4 + $0x480] sm:$0xff] }
  0x6a   : > { %1289 = vmatprep.subr.bf16.mxu0 %v1288_v51  ;;  %v1308_v18 = vpack.c.bf16 %v699_v16, %v691_v15  ;;  %v698_v20 = vld [vmem:[#allocation4 + $0x4c0] sm:$0xff]  ;;  %v707_v21 = vld [vmem:[#allocation4 + $0x508] sm:$0xff] }
  0x6b   : > { %v715_v22 = vld [vmem:[#allocation4 + $0x548] sm:$0xff]  ;;  %v1310_v23 = vpack.c.bf16 %v698_v20, %v690_v19  ;;  %v706_v25 = vld [vmem:[#allocation4 + $0x500] sm:$0xff] }
  0x6c   : > { %v1312_v24 = vpack.c.bf16 %v715_v22, %v707_v21  ;;  %v714_v26 = vld [vmem:[#allocation4 + $0x540] sm:$0xff]  ;;  %v723_v27 = vld [vmem:[#allocation4 + $0x588] sm:$0xff] }
  0x6d   : > { %1291 = vmatpush1.bf16.msra.mxu0 %v1290_v56  ;;  %v731_v28 = vld [vmem:[#allocation4 + $0x5c8] sm:$0xff]  ;;  %v1314_v29 = vpack.c.bf16 %v714_v26, %v706_v25  ;;  %v722_v31 = vld [vmem:[#allocation4 + $0x580] sm:$0xff]  ;;  %v556_v25 = vld [vmem:[#allocation4 + $0x50] sm:$0xff] }
  0x6e   : > { %1293 = vmatprep.subr.bf16.mxu0 %v1292_v57  ;;  %v1316_v30 = vpack.c.bf16 %v731_v28, %v723_v27  ;;  %v730_v32 = vld [vmem:[#allocation4 + $0x5c0] sm:$0xff]  ;;  %v739_v33 = vld [vmem:[#allocation4 + $0x608] sm:$0xff]  ;;  %v565_v26 = vld [vmem:[#allocation4 + $0x98] sm:$0xff] }
  0x6f   : > { %v747_v34 = vld [vmem:[#allocation4 + $0x648] sm:$0xff]  ;;  %v1318_v35 = vpack.c.bf16 %v730_v32, %v722_v31  ;;  %v738_v37 = vld [vmem:[#allocation4 + $0x600] sm:$0xff]  ;;  %v573_v27 = vld [vmem:[#allocation4 + $0xd8] sm:$0xff] }
  0x70   : > { %v1320_v36 = vpack.c.bf16 %v747_v34, %v739_v33  ;;  %v746_v38 = vld [vmem:[#allocation4 + $0x640] sm:$0xff]  ;;  %v755_v39 = vld [vmem:[#allocation4 + $0x688] sm:$0xff]  ;;  %v564_v31 = vld [vmem:[#allocation4 + $0x90] sm:$0xff] }
  0x71   : > { %1295 = vmatpush1.bf16.msra.mxu0 %v1294_v62  ;;  %v763_v40 = vld [vmem:[#allocation4 + $0x6c8] sm:$0xff]  ;;  %v1322_v41 = vpack.c.bf16 %v746_v38, %v738_v37  ;;  %v754_v43 = vld [vmem:[#allocation4 + $0x680] sm:$0xff]  ;;  %v572_v32 = vld [vmem:[#allocation4 + $0xd0] sm:$0xff] }
  0x72   : > { %1297 = vmatprep.subr.bf16.mxu0 %v1296_v63  ;;  %v1324_v42 = vpack.c.bf16 %v763_v40, %v755_v39  ;;  %v762_v44 = vld [vmem:[#allocation4 + $0x6c0] sm:$0xff]  ;;  %v771_v45 = vld [vmem:[#allocation4 + $0x708] sm:$0xff]  ;;  %v581_v33 = vld [vmem:[#allocation4 + $0x118] sm:$0xff] }
  0x73   : > { %v779_v46 = vld [vmem:[#allocation4 + $0x748] sm:$0xff]  ;;  %v1326_v47 = vpack.c.bf16 %v762_v44, %v754_v43  ;;  %v770_v49 = vld [vmem:[#allocation4 + $0x700] sm:$0xff]  ;;  %v589_v34 = vld [vmem:[#allocation4 + $0x158] sm:$0xff] }
  0x74   : > { %v1328_v48 = vpack.c.bf16 %v779_v46, %v771_v45  ;;  %v778_v50 = vld [vmem:[#allocation4 + $0x740] sm:$0xff]  ;;  %v1344_v37 = vpack.c.bf16 %v589_v34, %v581_v33  ;;  %v580_v38 = vld [vmem:[#allocation4 + $0x110] sm:$0xff]  ;;  %v597_v40 = vld [vmem:[#allocation4 + $0x198] sm:$0xff] }
  0x75   : > { %1299 = vmatpush1.bf16.msra.mxu0 %v1298_v5  ;;  %v1330_v51 = vpack.c.bf16 %v778_v50, %v770_v49  ;;  %v433_v28 = vld [vmem:[%s1991_s3] sm:$0xff]  ;;  %v588_v39 = vld [vmem:[#allocation4 + $0x150] sm:$0xff] }
  0x76   : > { %1301 = vmatprep.subr.bf16.mxu0 %v1300_v6  ;;  %v1346_v43 = vpack.c.bf16 %v588_v39, %v580_v38  ;;  %v596_v45 = vld [vmem:[#allocation4 + $0x190] sm:$0xff]  ;;  %v765_v38 = vld [vmem:[#allocation4 + $0x6d8] sm:$0xff] }
  0x77   : > { %v604_v46 = vld [vmem:[#allocation4 + $0x1d0] sm:$0xff] }
  0x78   : > { %v1350_v49 = vpack.c.bf16 %v604_v46, %v596_v45 }
  0x79   : > { %1303 = vmatpush1.bf16.msra.mxu0 %v1302_v11 }
  0x7a   : > { %1305 = vmatprep.subr.bf16.mxu0 %v1304_v12 }
  0x7d   : > { %1307 = vmatpush1.bf16.msra.mxu0 %v1306_v17  ;;  %v549_v17 = vld [vmem:[#allocation4 + $0x18] sm:$0xff] }
  0x7e   : > { %1309 = vmatprep.subr.bf16.mxu0 %v1308_v18  ;;  %v557_v18 = vld [vmem:[#allocation4 + $0x58] sm:$0xff] }
  0x81   : > { %1311 = vmatpush1.bf16.msra.mxu0 %v1310_v23  ;;  %v1336_v23 = vpack.c.bf16 %v557_v18, %v549_v17  ;;  %v692_v17 = vld [vmem:[#allocation4 + $0x490] sm:$0xff] }
  0x82   : > { %1313 = vmatprep.subr.bf16.mxu0 %v1312_v24  ;;  %v548_v24 = vld [vmem:[#allocation4 + $0x10] sm:$0xff] }
  0x83   : > { %v700_v18 = vld [vmem:[#allocation4 + $0x4d0] sm:$0xff] }
  0x85   : > { %1315 = vmatpush1.bf16.msra.mxu0 %v1314_v29  ;;  %v1338_v29 = vpack.c.bf16 %v556_v25, %v548_v24  ;;  %v716_v24 = vld [vmem:[#allocation4 + $0x550] sm:$0xff]  ;;  %v725_v25 = vld [vmem:[#allocation4 + $0x598] sm:$0xff] }
  0x86   : > { %1317 = vmatprep.subr.bf16.mxu0 %v1316_v30  ;;  %v1340_v30 = vpack.c.bf16 %v573_v27, %v565_v26  ;;  %v733_v26 = vld [vmem:[#allocation4 + $0x5d8] sm:$0xff] }
  0x89   : > { %1319 = vmatpush1.bf16.msra.mxu0 %v1318_v35  ;;  %v434_v35 = vld [vmem:[%s1991_s3 + $0x8] sm:$0xff] }
  0x8a   : > { %1321 = vmatprep.subr.bf16.mxu0 %v1320_v36  ;;  %v1342_v36 = vpack.c.bf16 %v572_v32, %v564_v31  ;;  %v741_v31 = vld [vmem:[#allocation4 + $0x618] sm:$0xff] }
  0x8b   : > { %v749_v32 = vld [vmem:[#allocation4 + $0x658] sm:$0xff] }
  0x8c   : > { %v1384_v34 = vpack.c.bf16 %v749_v32, %v741_v31 }
  0x8d   : > { %1323 = vmatpush1.bf16.msra.mxu0 %v1322_v41  ;;  %v605_v41 = vld [vmem:[#allocation4 + $0x1d8] sm:$0xff] }
  0x8e   : > { %1325 = vmatprep.subr.bf16.mxu0 %v1324_v42  ;;  %v435_v42 = vld [vmem:[%s1991_s3 + $0x10] sm:$0x7]  ;;  %v1348_v44 = vpack.c.bf16 %v605_v41, %v597_v40 }
  0x8f   : > { %v756_v41 = vld [vmem:[#allocation4 + $0x690] sm:$0xff] }
  0x91   : > { %1327 = vmatpush1.bf16.msra.mxu0 %v1326_v47  ;;  %v613_v47 = vld [vmem:[#allocation4 + $0x218] sm:$0xff] }
  0x92   : > { %1329 = vmatprep.subr.bf16.mxu0 %v1328_v48  ;;  %v621_v48 = vld [vmem:[#allocation4 + $0x258] sm:$0xff] }
  0x93   : > { %v1352_v50 = vpack.c.bf16 %v621_v48, %v613_v47  ;;  %v772_v47 = vld [vmem:[#allocation4 + $0x710] sm:$0xff] }
  0x94   : > { %v780_v48 = vld [vmem:[#allocation4 + $0x750] sm:$0xff] }
  0x95   : > { %1331 = vmatpush1.bf16.msra.mxu0 %v1330_v51  ;;  %v612_v51 = vld [vmem:[#allocation4 + $0x210] sm:$0xff] }
  0xd3   : > { %v306_v52 = vpop.permute.xlu0 %305 }
  0xd4   : > { %v316_v61 = vpop.permute.xlu1 %315 }
  0xd7   : > { %v311_v56 = vpop.permute.xlu0 %310 }
  0xd8   : > { %v321_v9 = vpop.permute.xlu1 %320 }
 0x12e   : > { %v402_v53 = vpop.f32.mrb[0].mxu0 }
 0x12f   : > { %v404_v54 = vpop.f32.mrb[1].mxu0  ;;  %v403_v55 = vadd.f32 %v402_v53, %v306_v52  ;;  %v637_v53 = vld [vmem:[#allocation4 + $0x2d8] sm:$0xff] }
 0x130   : > { %v405_v57 = vadd.f32 %v404_v54, %v306_v52  ;;  %v629_v52 = vld [vmem:[#allocation4 + $0x298] sm:$0xff] }
 0x131   : > { %v425_v63 = vmax.f32 %v403_v55, 0.0  ;;  %v1356_v55 = vpack.c.bf16 %v637_v53, %v629_v52  ;;  %v797_v53 = vld [vmem:[#allocation4 + $0x7d8] sm:$0xff] }
 0x132   : > { %v408_v58 = vpop.f32.mrb[2].mxu0  ;;  %v426_v2 = vmax.f32 %v405_v57, 0.0  ;;  %v636_v57 = vld [vmem:[#allocation4 + $0x2d0] sm:$0xff] }
 0x133   : > { %v409_v59 = vadd.f32 %v408_v58, %v311_v56  ;;  %v410_v60 = vpop.f32.mrb[3].mxu0  ;;  %v645_v58 = vld [vmem:[#allocation4 + $0x318] sm:$0xff] }
 0x134   : > { %v411_v62 = vadd.f32 %v410_v60, %v311_v56  ;;  %v628_v56 = vld [vmem:[#allocation4 + $0x290] sm:$0xff] }
 0x135   : > { %v427_v1 = vmax.f32 %v409_v59, 0.0  ;;  %v653_v59 = vld [vmem:[#allocation4 + $0x358] sm:$0xff]  ;;  %v1358_v60 = vpack.c.bf16 %v636_v57, %v628_v56 }
 0x136   : > { %v428_v3 = vmax.f32 %v411_v62, 0.0  ;;  %v414_v4 = vpop.f32.mrb[4].mxu0  ;;  %v644_v62 = vld [vmem:[#allocation4 + $0x310] sm:$0xff] }
 0x137   : > { %v416_v5 = vpop.f32.mrb[5].mxu0  ;;  %v1266_v6 = vpack.c.bf16 %v427_v1, %v425_v63  ;;  %v415_v8 = vadd.f32 %v414_v4, %v316_v61  ;;  %v652_v63 = vld [vmem:[#allocation4 + $0x350] sm:$0xff]  ;;  %v661_v1 = vld [vmem:[#allocation4 + $0x398] sm:$0xff] }
 0x138   : > { %v1264_v7 = vpack.c.bf16 %v428_v3, %v426_v2  ;;  %v417_v10 = vadd.f32 %v416_v5, %v316_v61  ;;  %v1360_v61 = vpack.c.bf16 %v653_v59, %v645_v58  ;;  %v669_v2 = vld [vmem:[#allocation4 + $0x3d8] sm:$0xff]  ;;  %v1362_v3 = vpack.c.bf16 %v652_v63, %v644_v62  ;;  %v660_v5 = vld [vmem:[#allocation4 + $0x390] sm:$0xff]  ;;  %v559_v62 = vld [vmem:[#allocation4 + $0x68] sm:$0xff] }
 0x139   : > { %v429_v15 = vmax.f32 %v415_v8, 0.0  ;;  %v1364_v4 = vpack.c.bf16 %v669_v2, %v661_v1  ;;  %v685_v8 = vld [vmem:[#allocation4 + $0x458] sm:$0xff]  ;;  %v788_v58 = vld [vmem:[#allocation4 + $0x790] sm:$0xff] }
 0x13a   : > { %v420_v11 = vpop.f32.mrb[6].mxu0  ;;  %1265 = vmatprep.subr.bf16.mxu1 %v1264_v7  ;;  %v430_v19 = vmax.f32 %v417_v10, 0.0  ;;  %v677_v7 = vld [vmem:[#allocation4 + $0x418] sm:$0xff]  ;;  %v796_v59 = vld [vmem:[#allocation4 + $0x7d0] sm:$0xff] }
 0x13b   : > { %v421_v12 = vadd.f32 %v420_v11, %v321_v9  ;;  %v422_v13 = vpop.f32.mrb[7].mxu0  ;;  %1267 = vmatpush1.bf16.msra.mxu1 %v1266_v6  ;;  %v668_v6 = vld [vmem:[#allocation4 + $0x3d0] sm:$0xff]  ;;  %v1368_v10 = vpack.c.bf16 %v685_v8, %v677_v7  ;;  %v553_v63 = vld [vmem:[#allocation4 + $0x38] sm:$0xff]  ;;  %v567_v8 = vld [vmem:[#allocation4 + $0xa8] sm:$0xff] }
 0x13c   : > { %v423_v14 = vadd.f32 %v422_v13, %v321_v9  ;;  %v1366_v9 = vpack.c.bf16 %v668_v6, %v660_v5  ;;  %v676_v11 = vld [vmem:[#allocation4 + $0x410] sm:$0xff]  ;;  %v693_v13 = vld [vmem:[#allocation4 + $0x498] sm:$0xff]  ;;  %v558_v5 = vld [vmem:[#allocation4 + $0x60] sm:$0xff] }
 0x13d   : > { %v431_v16 = vmax.f32 %v421_v12, 0.0  ;;  %v684_v12 = vld [vmem:[#allocation4 + $0x450] sm:$0xff]  ;;  %v561_v2 = vld [vmem:[#allocation4 + $0x78] sm:$0xff] }
 0x13e   : > { %v432_v20 = vmax.f32 %v423_v14, 0.0  ;;  %v701_v14 = vld [vmem:[#allocation4 + $0x4d8] sm:$0xff]  ;;  %v552_v6 = vld [vmem:[#allocation4 + $0x30] sm:$0xff] }
 0x13f   : > { %v1270_v21 = vpack.c.bf16 %v431_v16, %v429_v15  ;;  %v1370_v15 = vpack.c.bf16 %v684_v12, %v676_v11  ;;  %v1372_v16 = vpack.c.bf16 %v701_v14, %v693_v13  ;;  %v560_v7 = vld [vmem:[#allocation4 + $0x70] sm:$0xff]  ;;  %v569_v11 = vld [vmem:[#allocation4 + $0xb8] sm:$0xff]  ;;  %v442_v13 = vpop.permute.xlu0 %441 }
 0x140   : > { %v1268_v22 = vpack.c.bf16 %v432_v20, %v430_v19  ;;  %v709_v19 = vld [vmem:[#allocation4 + $0x518] sm:$0xff] }
 0x141   : > { %v717_v20 = vld [vmem:[#allocation4 + $0x558] sm:$0xff] }
 0x142   : > { %1269 = vmatprep.subr.bf16.mxu1 %v1268_v22  ;;  %v1376_v22 = vpack.c.bf16 %v717_v20, %v709_v19  ;;  %v577_v12 = vld [vmem:[#allocation4 + $0xf8] sm:$0xff]  ;;  %v574_v19 = vld [vmem:[#allocation4 + $0xe0] sm:$0xff] }
 0x143   : > { %1271 = vmatpush1.bf16.msra.mxu1 %v1270_v21  ;;  %v1374_v21 = vpack.c.bf16 %v700_v18, %v692_v17  ;;  %v1466_v17 = vpack.c.bf16 %v560_v7, %v552_v6  ;;  %v566_v18 = vld [vmem:[#allocation4 + $0xa0] sm:$0xff]  ;;  %v624_v6 = vld [vmem:[#allocation4 + $0x270] sm:$0xff]  ;;  %v631_v7 = vld [vmem:[#allocation4 + $0x2a8] sm:$0xff] }
 0x144   : > { %1337 = vmatprep.subr.bf16.mxu1 %v1336_v23  ;;  %v708_v23 = vld [vmem:[#allocation4 + $0x510] sm:$0xff] }
 0x145   : > { %v1378_v27 = vpack.c.bf16 %v716_v24, %v708_v23  ;;  %v568_v23 = vld [vmem:[#allocation4 + $0xb0] sm:$0xff] }
 0x146   : > { %1250 = vmatmul.mubr.msk.f32.vlgmr.msra.gmra.mrb[0].mxu1 %vm323_vm0, %v433_v28  ;;  %v1380_v28 = vpack.c.bf16 %v733_v26, %v725_v25  ;;  %v576_v24 = vld [vmem:[#allocation4 + $0xf0] sm:$0xff]  ;;  %v583_v25 = vld [vmem:[#allocation4 + $0x128] sm:$0xff] }
 0x147   : > { %533 = vmatprep.mubr.f32.mxu1 %v1691_v0  ;;  %1339 = vmatpush1.bf16.msra.mxu1 %v1338_v29  ;;  %v724_v29 = vld [vmem:[#allocation4 + $0x590] sm:$0xff] }
 0x148   : > { %1341 = vmatprep.subr.bf16.mxu1 %v1340_v30  ;;  %v732_v30 = vld [vmem:[#allocation4 + $0x5d0] sm:$0xff] }
 0x149   : > { %v1382_v33 = vpack.c.bf16 %v732_v30, %v724_v29  ;;  %v593_v29 = vld [vmem:[#allocation4 + $0x178] sm:$0xff]  ;;  %v447_v30 = vpop.permute.xlu1 %446 }
 0x14a   : > { %1251 = vmatmul.mubr.msk.f32.gmra.mrb[2].mxu1 %vm323_vm0, %v434_v35  ;;  %v740_v35 = vld [vmem:[#allocation4 + $0x610] sm:$0xff] }
 0x14b   : > { %539 = vmatprep.mubr.f32.mxu1 %v1691_v0  ;;  %1343 = vmatpush1.bf16.msra.mxu1 %v1342_v36  ;;  %v620_v0 = vld [vmem:[#allocation4 + $0x250] sm:$0xff] }
 0x14c   : > { %1345 = vmatprep.subr.bf16.mxu1 %v1344_v37  ;;  %v1354_v54 = vpack.c.bf16 %v620_v0, %v612_v51  ;;  %v748_v36 = vld [vmem:[#allocation4 + $0x650] sm:$0xff]  ;;  %v757_v37 = vld [vmem:[#allocation4 + $0x698] sm:$0xff]  ;;  %v795_v51 = vld [vmem:[#allocation4 + $0x7c8] sm:$0xff] }
 0x14d   : > { %v1386_v39 = vpack.c.bf16 %v748_v36, %v740_v35  ;;  %v1388_v40 = vpack.c.bf16 %v765_v38, %v757_v37  ;;  %v789_v0 = vld [vmem:[#allocation4 + $0x798] sm:$0xff]  ;;  %v582_v35 = vld [vmem:[#allocation4 + $0x120] sm:$0xff] }
 0x14e   : > { %1252 = vmatmul.mubr.msk.f32.gmra.mrb[4].mxu1 %vm323_vm0, %v435_v42  ;;  %v764_v42 = vld [vmem:[#allocation4 + $0x6d0] sm:$0xff]  ;;  %v1396_v56 = vpack.c.bf16 %v797_v53, %v789_v0  ;;  %v598_v0 = vld [vmem:[#allocation4 + $0x1a0] sm:$0xff] }
 0x14f   : > { %1347 = vmatpush1.bf16.msra.mxu1 %v1346_v43  ;;  %v773_v43 = vld [vmem:[#allocation4 + $0x718] sm:$0xff]  ;;  %v1390_v45 = vpack.c.bf16 %v764_v42, %v756_v41  ;;  %v592_v41 = vld [vmem:[#allocation4 + $0x170] sm:$0xff] }
 0x150   : > { %1349 = vmatprep.subr.bf16.mxu1 %v1348_v44  ;;  %v781_v44 = vld [vmem:[#allocation4 + $0x758] sm:$0xff] }
 0x151   : > { %v1392_v46 = vpack.c.bf16 %v781_v44, %v773_v43  ;;  %v599_v43 = vld [vmem:[#allocation4 + $0x1a8] sm:$0xff]  ;;  %v452_v44 = vpop.permute.xlu0 %451 }
 0x153   : > { %1351 = vmatpush1.bf16.msra.mxu1 %v1350_v49  ;;  %v1394_v49 = vpack.c.bf16 %v780_v48, %v772_v47  ;;  %v601_v47 = vld [vmem:[#allocation4 + $0x1b8] sm:$0xff] }
 0x154   : > { %1353 = vmatprep.subr.bf16.mxu1 %v1352_v50  ;;  %v787_v50 = vld [vmem:[#allocation4 + $0x788] sm:$0xff]  ;;  %v609_v48 = vld [vmem:[#allocation4 + $0x1f8] sm:$0xff] }
 0x155   : > { %v1332_v52 = vpack.c.bf16 %v795_v51, %v787_v50 }
 0x157   : > { %1355 = vmatpush1.bf16.msra.mxu1 %v1354_v54  ;;  %v786_v54 = vld [vmem:[#allocation4 + $0x780] sm:$0xff]  ;;  %1333 = vmatprep.subr.bf16.mxu0 %v1332_v52 }
 0x158   : > { %1357 = vmatprep.subr.bf16.mxu1 %v1356_v55  ;;  %v794_v55 = vld [vmem:[#allocation4 + $0x7c0] sm:$0xff] }
 0x159   : > { %v1334_v57 = vpack.c.bf16 %v794_v55, %v786_v54  ;;  %v606_v52 = vld [vmem:[#allocation4 + $0x1e0] sm:$0xff]  ;;  %v600_v54 = vld [vmem:[#allocation4 + $0x1b0] sm:$0xff] }
 0x15a   : > { %v608_v55 = vld [vmem:[#allocation4 + $0x1f0] sm:$0xff] }
 0x15b   : > { %1359 = vmatpush1.bf16.msra.mxu1 %v1358_v60  ;;  %v1398_v60 = vpack.c.bf16 %v796_v59, %v788_v58  ;;  %1335 = vmatpush1.bf16.msra.mxu0 %v1334_v57  ;;  %v1476_v58 = vpack.c.bf16 %v609_v48, %v601_v47  ;;  %v623_v59 = vld [vmem:[#allocation4 + $0x268] sm:$0xff]  ;;  %v681_v48 = vld [vmem:[#allocation4 + $0x438] sm:$0xff] }
 0x15c   : > { %1361 = vmatprep.subr.bf16.mxu1 %v1360_v61  ;;  %v551_v61 = vld [vmem:[#allocation4 + $0x28] sm:$0xff] }
 0x15d   : > { %v1400_v1 = vpack.c.bf16 %v559_v62, %v551_v61  ;;  %v625_v61 = vld [vmem:[#allocation4 + $0x278] sm:$0xff]  ;;  %v1414_v62 = vpack.c.bf16 %v606_v52, %v598_v0  ;;  %v687_v47 = vld [vmem:[#allocation4 + $0x468] sm:$0xff]  ;;  %v678_v52 = vld [vmem:[#allocation4 + $0x420] sm:$0xff] }
 0x15f   : > { %1363 = vmatpush1.bf16.msra.mxu1 %v1362_v3  ;;  %v1464_v3 = vpack.c.bf16 %v561_v2, %v553_v63  ;;  %1401 = vmatprep.subr.bf16.mxu0 %v1400_v1  ;;  %v1478_v63 = vpack.c.bf16 %v608_v55, %v600_v54  ;;  %v614_v1 = vld [vmem:[#allocation4 + $0x220] sm:$0xff] }
 0x160   : > { %1365 = vmatprep.subr.bf16.mxu1 %v1364_v4  ;;  %v550_v4 = vld [vmem:[#allocation4 + $0x20] sm:$0xff] }
 0x161   : > { %v622_v2 = vld [vmem:[#allocation4 + $0x260] sm:$0xff] }
 0x162   : > { %v686_v54 = vld [vmem:[#allocation4 + $0x460] sm:$0xff] }
 0x163   : > { %1367 = vmatpush1.bf16.msra.mxu1 %v1366_v9 }
 0x164   : > { %1369 = vmatprep.subr.bf16.mxu1 %v1368_v10  ;;  %v575_v10 = vld [vmem:[#allocation4 + $0xe8] sm:$0xff] }
 0x167   : > { %1371 = vmatpush1.bf16.msra.mxu1 %v1370_v15 }
 0x168   : > { %1373 = vmatprep.subr.bf16.mxu1 %v1372_v16  ;;  %v1402_v16 = vpack.c.bf16 %v558_v5, %v550_v4  ;;  %v616_v5 = vld [vmem:[#allocation4 + $0x230] sm:$0xff] }
 0x16b   : > { %1375 = vmatpush1.bf16.msra.mxu1 %v1374_v21  ;;  %v1404_v21 = vpack.c.bf16 %v575_v10, %v567_v8  ;;  %v639_v8 = vld [vmem:[#allocation4 + $0x2e8] sm:$0xff]  ;;  %v641_v10 = vld [vmem:[#allocation4 + $0x2f8] sm:$0xff] }
 0x16c   : > { %1377 = vmatprep.subr.bf16.mxu1 %v1376_v22  ;;  %v1468_v22 = vpack.c.bf16 %v577_v12, %v569_v11  ;;  %v1418_v11 = vpack.c.bf16 %v622_v2, %v614_v1  ;;  %v1482_v12 = vpack.c.bf16 %v624_v6, %v616_v5  ;;  %v694_v2 = vld [vmem:[#allocation4 + $0x4a0] sm:$0xff]  ;;  %v696_v6 = vld [vmem:[#allocation4 + $0x4b0] sm:$0xff] }
 0x16f   : > { %1379 = vmatpush1.bf16.msra.mxu1 %v1378_v27  ;;  %v591_v27 = vld [vmem:[#allocation4 + $0x168] sm:$0xff] }
 0x170   : > { %1381 = vmatprep.subr.bf16.mxu1 %v1380_v28  ;;  %v585_v28 = vld [vmem:[#allocation4 + $0x138] sm:$0xff]  ;;  %v1408_v37 = vpack.c.bf16 %v591_v27, %v583_v25  ;;  %v654_v27 = vld [vmem:[#allocation4 + $0x360] sm:$0xff] }
 0x171   : > { %v1472_v38 = vpack.c.bf16 %v593_v29, %v585_v28 }
 0x173   : > { %1383 = vmatpush1.bf16.msra.mxu1 %v1382_v33  ;;  %v1406_v33 = vpack.c.bf16 %v574_v19, %v566_v18  ;;  %v640_v18 = vld [vmem:[#allocation4 + $0x2f0] sm:$0xff]  ;;  %v647_v19 = vld [vmem:[#allocation4 + $0x328] sm:$0xff] }
 0x174   : > { %1385 = vmatprep.subr.bf16.mxu1 %v1384_v34  ;;  %v1470_v34 = vpack.c.bf16 %v576_v24, %v568_v23  ;;  %v657_v23 = vld [vmem:[#allocation4 + $0x378] sm:$0xff] }
 0x177   : > { %1387 = vmatpush1.bf16.msra.mxu1 %v1386_v39  ;;  %v590_v39 = vld [vmem:[#allocation4 + $0x160] sm:$0xff] }
 0x178   : > { %1389 = vmatprep.subr.bf16.mxu1 %v1388_v40  ;;  %v584_v40 = vld [vmem:[#allocation4 + $0x130] sm:$0xff]  ;;  %v1410_v50 = vpack.c.bf16 %v590_v39, %v582_v35  ;;  %v665_v35 = vld [vmem:[#allocation4 + $0x3b8] sm:$0xff] }
 0x179   : > { %v1474_v51 = vpack.c.bf16 %v592_v41, %v584_v40  ;;  %v662_v40 = vld [vmem:[#allocation4 + $0x3a0] sm:$0xff] }
 0x17a   : > { %v670_v41 = vld [vmem:[#allocation4 + $0x3e0] sm:$0xff] }
 0x17b   : > { %1391 = vmatpush1.bf16.msra.mxu1 %v1390_v45 }
 0x17c   : > { %1393 = vmatprep.subr.bf16.mxu1 %v1392_v46  ;;  %v607_v46 = vld [vmem:[#allocation4 + $0x1e8] sm:$0xff] }
 0x17d   : > { %v1412_v57 = vpack.c.bf16 %v607_v46, %v599_v43  ;;  %v679_v46 = vld [vmem:[#allocation4 + $0x428] sm:$0xff] }
 0x17e   : > { %v1432_v55 = vpack.c.bf16 %v687_v47, %v679_v46  ;;  %v752_v46 = vld [vmem:[#allocation4 + $0x670] sm:$0xff]  ;;  %v759_v47 = vld [vmem:[#allocation4 + $0x6a8] sm:$0xff] }
 0x17f   : > { %1395 = vmatpush1.bf16.msra.mxu1 %v1394_v49 }
 0x180   : > { %1397 = vmatprep.subr.bf16.mxu1 %v1396_v56  ;;  %v615_v56 = vld [vmem:[#allocation4 + $0x228] sm:$0xff] }
 0x183   : > { %1399 = vmatpush1.bf16.msra.mxu1 %v1398_v60  ;;  %v617_v60 = vld [vmem:[#allocation4 + $0x238] sm:$0xff] }
 0x184   : > { %1465 = vmatprep.subr.bf16.mxu1 %v1464_v3  ;;  %v1416_v3 = vpack.c.bf16 %v623_v59, %v615_v56  ;;  %v1480_v4 = vpack.c.bf16 %v625_v61, %v617_v60  ;;  %v695_v59 = vld [vmem:[#allocation4 + $0x4a8] sm:$0xff]  ;;  %v697_v61 = vld [vmem:[#allocation4 + $0x4b8] sm:$0xff] }
 0x185   : > { %v703_v60 = vld [vmem:[#allocation4 + $0x4e8] sm:$0xff] }
 0x219   : > { %v529_v9 = vpop.f32.mrb[0].mxu1 }
 0x21a   : > { %v531_v14 = vpop.f32.mrb[1].mxu1  ;;  %v1910_v20 = vadd.f32 %v529_v9, %v442_v13  ;;  %v633_v9 = vld [vmem:[#allocation4 + $0x2b8] sm:$0xff] }
 0x21b   : > { %v1908_v15 = vadd.f32 %v531_v14, %v442_v13  ;;  %v630_v13 = vld [vmem:[#allocation4 + $0x2a0] sm:$0xff] }
 0x21c   : > { %v638_v14 = vld [vmem:[#allocation4 + $0x2e0] sm:$0xff] }
 0x21d   : > { %v535_v26 = vpop.f32.mrb[2].mxu1  ;;  %866 = vmatprep.mubr.f32.mxu0 %v1908_v15  ;;  %949 = vmatprep.mubr.f32.mxu1 %v1908_v15  ;;  %v1422_v24 = vpack.c.bf16 %v638_v14, %v630_v13  ;;  %v710_v14 = vld [vmem:[#allocation4 + $0x520] sm:$0xff] }
 0x21e   : > { %v537_v31 = vpop.f32.mrb[3].mxu1  ;;  %867 = vmatmul.mubr.f32.vlgmr.msra.gmra.mrb[8].mxu0 %v1910_v20  ;;  %950 = vmatmul.mubr.f32.vlgmr.msra.gmra.mrb[6].mxu1 %v1910_v20  ;;  %v1918_v36 = vadd.f32 %v535_v26, %v447_v30  ;;  %v646_v26 = vld [vmem:[#allocation4 + $0x320] sm:$0xff] }
 0x21f   : > { %v1916_v32 = vadd.f32 %v537_v31, %v447_v30  ;;  %1403 = vmatpush1.bf16.msra.mxu0 %v1402_v16  ;;  %1467 = vmatpush1.bf16.msra.mxu1 %v1466_v17  ;;  %v1420_v16 = vpack.c.bf16 %v639_v8, %v631_v7  ;;  %v632_v17 = vld [vmem:[#allocation4 + $0x2b0] sm:$0xff]  ;;  %v711_v8 = vld [vmem:[#allocation4 + $0x528] sm:$0xff] }
 0x220   : > { %1405 = vmatprep.subr.bf16.mxu0 %v1404_v21  ;;  %1469 = vmatprep.subr.bf16.mxu1 %v1468_v22  ;;  %v655_v21 = vld [vmem:[#allocation4 + $0x368] sm:$0xff]  ;;  %v649_v22 = vld [vmem:[#allocation4 + $0x338] sm:$0xff]  ;;  %v1486_v25 = vpack.c.bf16 %v640_v18, %v632_v17  ;;  %v648_v30 = vld [vmem:[#allocation4 + $0x330] sm:$0xff] }
 0x221   : > { %v541_v42 = vpop.f32.mrb[4].mxu1  ;;  %872 = vmatprep.mubr.f32.mxu0 %v1916_v32  ;;  %955 = vmatprep.mubr.f32.mxu1 %v1916_v32  ;;  %v1424_v28 = vpack.c.bf16 %v655_v21, %v647_v19  ;;  %v1488_v29 = vpack.c.bf16 %v657_v23, %v649_v22  ;;  %v656_v31 = vld [vmem:[#allocation4 + $0x370] sm:$0xff]  ;;  %v727_v21 = vld [vmem:[#allocation4 + $0x5a8] sm:$0xff]  ;;  %v729_v23 = vld [vmem:[#allocation4 + $0x5b8] sm:$0xff] }
 0x222   : > { %v543_v45 = vpop.f32.mrb[5].mxu1  ;;  %873 = vmatmul.mubr.f32.gmra.mrb[10].mxu0 %v1918_v36  ;;  %956 = vmatmul.mubr.f32.gmra.mrb[8].mxu1 %v1918_v36  ;;  %v1926_v53 = vadd.f32 %v541_v42, %v452_v44  ;;  %v1490_v39 = vpack.c.bf16 %v656_v31, %v648_v30  ;;  %v704_v7 = vld [vmem:[#allocation4 + $0x4f0] sm:$0xff]  ;;  %v735_v22 = vld [vmem:[#allocation4 + $0x5e8] sm:$0xff] }
 0x223   : > { %v1924_v49 = vadd.f32 %v543_v45, %v452_v44  ;;  %1407 = vmatpush1.bf16.msra.mxu0 %v1406_v33  ;;  %1471 = vmatpush1.bf16.msra.mxu1 %v1470_v34  ;;  %v663_v33 = vld [vmem:[#allocation4 + $0x3a8] sm:$0xff]  ;;  %v664_v44 = vld [vmem:[#allocation4 + $0x3b0] sm:$0xff]  ;;  %v1502_v13 = vpack.c.bf16 %v704_v7, %v696_v6 }
 0x224   : > { %1409 = vmatprep.subr.bf16.mxu0 %v1408_v37  ;;  %1473 = vmatprep.subr.bf16.mxu1 %v1472_v38  ;;  %v671_v34 = vld [vmem:[#allocation4 + $0x3e8] sm:$0xff]  ;;  %v673_v37 = vld [vmem:[#allocation4 + $0x3f8] sm:$0xff]  ;;  %v1426_v38 = vpack.c.bf16 %v654_v27, %v646_v26  ;;  %v672_v45 = vld [vmem:[#allocation4 + $0x3f0] sm:$0xff] }
 0x225   : > { %878 = vmatprep.mubr.f32.mxu0 %v1924_v49  ;;  %961 = vmatprep.mubr.f32.mxu1 %v1924_v49  ;;  %v1428_v42 = vpack.c.bf16 %v671_v34, %v663_v33  ;;  %v1492_v43 = vpack.c.bf16 %v673_v37, %v665_v35  ;;  %v1494_v0 = vpack.c.bf16 %v672_v45, %v664_v44  ;;  %v712_v18 = vld [vmem:[#allocation4 + $0x530] sm:$0xff]  ;;  %v726_v27 = vld [vmem:[#allocation4 + $0x5a0] sm:$0xff]  ;;  %v743_v34 = vld [vmem:[#allocation4 + $0x628] sm:$0xff] }
 0x226   : > { %879 = vmatmul.mubr.f32.gmra.mrb[12].mxu0 %v1926_v53  ;;  %962 = vmatmul.mubr.f32.gmra.mrb[10].mxu1 %v1926_v53  ;;  %v720_v19 = vld [vmem:[#allocation4 + $0x570] sm:$0xff]  ;;  %v751_v35 = vld [vmem:[#allocation4 + $0x668] sm:$0xff]  ;;  %v745_v37 = vld [vmem:[#allocation4 + $0x638] sm:$0xff] }
 0x227   : > { %1411 = vmatpush1.bf16.msra.mxu0 %v1410_v50  ;;  %1475 = vmatpush1.bf16.msra.mxu1 %v1474_v51  ;;  %v689_v50 = vld [vmem:[#allocation4 + $0x478] sm:$0xff]  ;;  %v1430_v51 = vpack.c.bf16 %v670_v41, %v662_v40  ;;  %v1506_v26 = vpack.c.bf16 %v720_v19, %v712_v18  ;;  %v728_v31 = vld [vmem:[#allocation4 + $0x5b0] sm:$0xff]  ;;  %v742_v41 = vld [vmem:[#allocation4 + $0x620] sm:$0xff] }
 0x228   : > { %1032 = vmatprep.mubr.f32.mxu0 %v1908_v15  ;;  %1115 = vmatprep.mubr.f32.mxu1 %v1908_v15  ;;  %v1484_v15 = vpack.c.bf16 %v641_v10, %v633_v9  ;;  %v1496_v56 = vpack.c.bf16 %v689_v50, %v681_v48  ;;  %v719_v9 = vld [vmem:[#allocation4 + $0x568] sm:$0xff]  ;;  %v713_v10 = vld [vmem:[#allocation4 + $0x538] sm:$0xff]  ;;  %v736_v33 = vld [vmem:[#allocation4 + $0x5f0] sm:$0xff] }
 0x229   : > { %1413 = vmatprep.subr.bf16.mxu0 %v1412_v57  ;;  %1477 = vmatprep.subr.bf16.mxu1 %v1476_v58  ;;  %v680_v57 = vld [vmem:[#allocation4 + $0x430] sm:$0xff]  ;;  %v1510_v40 = vpack.c.bf16 %v736_v33, %v728_v31  ;;  %v767_v48 = vld [vmem:[#allocation4 + $0x6e8] sm:$0xff]  ;;  %v761_v50 = vld [vmem:[#allocation4 + $0x6b8] sm:$0xff] }
 0x22a   : > { %v688_v58 = vld [vmem:[#allocation4 + $0x470] sm:$0xff]  ;;  %v798_v18 = vld [vmem:[#allocation4 + $0x7e0] sm:$0xff] }
 0x22b   : > { %1415 = vmatpush1.bf16.msra.mxu0 %v1414_v62  ;;  %1479 = vmatpush1.bf16.msra.mxu1 %v1478_v63  ;;  %v705_v62 = vld [vmem:[#allocation4 + $0x4f8] sm:$0xff]  ;;  %v1434_v63 = vpack.c.bf16 %v686_v54, %v678_v52  ;;  %v1498_v1 = vpack.c.bf16 %v688_v58, %v680_v57  ;;  %v744_v45 = vld [vmem:[#allocation4 + $0x630] sm:$0xff]  ;;  %v758_v54 = vld [vmem:[#allocation4 + $0x6a0] sm:$0xff] }
 0x22c   : > { %1417 = vmatprep.subr.bf16.mxu0 %v1416_v3  ;;  %1481 = vmatprep.subr.bf16.mxu1 %v1480_v4  ;;  %v702_v3 = vld [vmem:[#allocation4 + $0x4e0] sm:$0xff]  ;;  %v1436_v4 = vpack.c.bf16 %v703_v60, %v695_v59  ;;  %v1500_v5 = vpack.c.bf16 %v705_v62, %v697_v61  ;;  %v1514_v52 = vpack.c.bf16 %v752_v46, %v744_v45  ;;  %v760_v58 = vld [vmem:[#allocation4 + $0x6b0] sm:$0xff]  ;;  %v775_v60 = vld [vmem:[#allocation4 + $0x728] sm:$0xff] }
 0x22d   : > { %v768_v59 = vld [vmem:[#allocation4 + $0x6f0] sm:$0xff]  ;;  %v783_v61 = vld [vmem:[#allocation4 + $0x768] sm:$0xff]  ;;  %v777_v62 = vld [vmem:[#allocation4 + $0x738] sm:$0xff] }
 0x22e   : > { %v776_v7 = vld [vmem:[#allocation4 + $0x730] sm:$0xff] }
 0x22f   : > { %1419 = vmatpush1.bf16.msra.mxu0 %v1418_v11  ;;  %1483 = vmatpush1.bf16.msra.mxu1 %v1482_v12  ;;  %v721_v11 = vld [vmem:[#allocation4 + $0x578] sm:$0xff]  ;;  %v1438_v12 = vpack.c.bf16 %v702_v3, %v694_v2  ;;  %v1518_v2 = vpack.c.bf16 %v768_v59, %v760_v58  ;;  %v774_v3 = vld [vmem:[#allocation4 + $0x720] sm:$0xff]  ;;  %v792_v19 = vld [vmem:[#allocation4 + $0x7b0] sm:$0xff] }
 0x230   : > { %1421 = vmatprep.subr.bf16.mxu0 %v1420_v16  ;;  %1485 = vmatprep.subr.bf16.mxu1 %v1484_v15  ;;  %v718_v16 = vld [vmem:[#allocation4 + $0x560] sm:$0xff]  ;;  %v1440_v15 = vpack.c.bf16 %v719_v9, %v711_v8  ;;  %v1504_v17 = vpack.c.bf16 %v721_v11, %v713_v10  ;;  %v784_v8 = vld [vmem:[#allocation4 + $0x770] sm:$0xff]  ;;  %v791_v9 = vld [vmem:[#allocation4 + $0x7a8] sm:$0xff] }
 0x231   : > { %v799_v10 = vld [vmem:[#allocation4 + $0x7e8] sm:$0xff]  ;;  %v793_v11 = vld [vmem:[#allocation4 + $0x7b8] sm:$0xff] }
 0x233   : > { %1423 = vmatpush1.bf16.msra.mxu0 %v1422_v24  ;;  %1487 = vmatpush1.bf16.msra.mxu1 %v1486_v25  ;;  %v737_v24 = vld [vmem:[#allocation4 + $0x5f8] sm:$0xff]  ;;  %v1442_v25 = vpack.c.bf16 %v718_v16, %v710_v14  ;;  %v1522_v14 = vpack.c.bf16 %v784_v8, %v776_v7  ;;  %v790_v16 = vld [vmem:[#allocation4 + $0x7a0] sm:$0xff] }
 0x234   : > { %1425 = vmatprep.subr.bf16.mxu0 %v1424_v28  ;;  %1489 = vmatprep.subr.bf16.mxu1 %v1488_v29  ;;  %v734_v28 = vld [vmem:[#allocation4 + $0x5e0] sm:$0xff]  ;;  %v1444_v29 = vpack.c.bf16 %v735_v22, %v727_v21  ;;  %v1508_v30 = vpack.c.bf16 %v737_v24, %v729_v23  ;;  %v800_v21 = vld [vmem:[#allocation4 + $0x7f0] sm:$0xff]  ;;  %v1462_v22 = vpack.c.bf16 %v798_v18, %v790_v16 }
 0x235   : > { %v1526_v23 = vpack.c.bf16 %v800_v21, %v792_v19 }
 0x237   : > { %1427 = vmatpush1.bf16.msra.mxu0 %v1426_v38  ;;  %1491 = vmatpush1.bf16.msra.mxu1 %v1490_v39  ;;  %v753_v38 = vld [vmem:[#allocation4 + $0x678] sm:$0xff]  ;;  %v1446_v39 = vpack.c.bf16 %v734_v28, %v726_v27 }
 0x238   : > { %1429 = vmatprep.subr.bf16.mxu0 %v1428_v42  ;;  %1493 = vmatprep.subr.bf16.mxu1 %v1492_v43  ;;  %v750_v42 = vld [vmem:[#allocation4 + $0x660] sm:$0xff]  ;;  %v1448_v43 = vpack.c.bf16 %v751_v35, %v743_v34  ;;  %v1512_v44 = vpack.c.bf16 %v753_v38, %v745_v37 }
 0x23b   : > { %1431 = vmatpush1.bf16.msra.mxu0 %v1430_v51  ;;  %1495 = vmatpush1.bf16.msra.mxu1 %v1494_v0  ;;  %v769_v51 = vld [vmem:[#allocation4 + $0x6f8] sm:$0xff]  ;;  %v1450_v0 = vpack.c.bf16 %v750_v42, %v742_v41 }
 0x23c   : > { %1433 = vmatprep.subr.bf16.mxu0 %v1432_v55  ;;  %1497 = vmatprep.subr.bf16.mxu1 %v1496_v56  ;;  %v766_v55 = vld [vmem:[#allocation4 + $0x6e0] sm:$0xff]  ;;  %v1452_v56 = vpack.c.bf16 %v767_v48, %v759_v47  ;;  %v1516_v57 = vpack.c.bf16 %v769_v51, %v761_v50 }
 0x23f   : > { %1435 = vmatpush1.bf16.msra.mxu0 %v1434_v63  ;;  %1499 = vmatpush1.bf16.msra.mxu1 %v1498_v1  ;;  %v785_v63 = vld [vmem:[#allocation4 + $0x778] sm:$0xff]  ;;  %v1454_v1 = vpack.c.bf16 %v766_v55, %v758_v54 }
 0x240   : > { %1437 = vmatprep.subr.bf16.mxu0 %v1436_v4  ;;  %1501 = vmatprep.subr.bf16.mxu1 %v1500_v5  ;;  %v782_v4 = vld [vmem:[#allocation4 + $0x760] sm:$0xff]  ;;  %v1456_v5 = vpack.c.bf16 %v783_v61, %v775_v60  ;;  %v1520_v6 = vpack.c.bf16 %v785_v63, %v777_v62 }
 0x243   : > { %1439 = vmatpush1.bf16.msra.mxu0 %v1438_v12  ;;  %1503 = vmatpush1.bf16.msra.mxu1 %v1502_v13  ;;  %v801_v12 = vld [vmem:[#allocation4 + $0x7f8] sm:$0xff]  ;;  %v1458_v13 = vpack.c.bf16 %v782_v4, %v774_v3 }
 0x244   : > { %1441 = vmatprep.subr.bf16.mxu0 %v1440_v15  ;;  %1505 = vmatprep.subr.bf16.mxu1 %v1504_v17  ;;  %v1460_v15 = vpack.c.bf16 %v799_v10, %v791_v9  ;;  %v1524_v17 = vpack.c.bf16 %v801_v12, %v793_v11 }
 0x247   : > { %1443 = vmatpush1.bf16.msra.mxu0 %v1442_v25  ;;  %1507 = vmatpush1.bf16.msra.mxu1 %v1506_v26 }
 0x248   : > { %1445 = vmatprep.subr.bf16.mxu0 %v1444_v29  ;;  %1509 = vmatprep.subr.bf16.mxu1 %v1508_v30 }
 0x24b   : > { %1447 = vmatpush1.bf16.msra.mxu0 %v1446_v39  ;;  %1511 = vmatpush1.bf16.msra.mxu1 %v1510_v40 }
 0x24c   : > { %1449 = vmatprep.subr.bf16.mxu0 %v1448_v43  ;;  %1513 = vmatprep.subr.bf16.mxu1 %v1512_v44 }
 0x24f   : > { %1451 = vmatpush1.bf16.msra.mxu0 %v1450_v0  ;;  %1515 = vmatpush1.bf16.msra.mxu1 %v1514_v52 }
 0x250   : > { %1453 = vmatprep.subr.bf16.mxu0 %v1452_v56  ;;  %1517 = vmatprep.subr.bf16.mxu1 %v1516_v57 }
 0x253   : > { %1455 = vmatpush1.bf16.msra.mxu0 %v1454_v1  ;;  %1519 = vmatpush1.bf16.msra.mxu1 %v1518_v2 }
 0x254   : > { %1457 = vmatprep.subr.bf16.mxu0 %v1456_v5  ;;  %1521 = vmatprep.subr.bf16.mxu1 %v1520_v6 }
 0x257   : > { %1459 = vmatpush1.bf16.msra.mxu0 %v1458_v13  ;;  %1523 = vmatpush1.bf16.msra.mxu1 %v1522_v14 }
 0x258   : > { %1461 = vmatprep.subr.bf16.mxu0 %v1460_v15  ;;  %1525 = vmatprep.subr.bf16.mxu1 %v1524_v17 }
 0x25b   : > { %1463 = vmatpush1.bf16.msra.mxu0 %v1462_v22  ;;  %1527 = vmatpush1.bf16.msra.mxu1 %v1526_v23 }
 0x25e   : > { %1033 = vmatmul.mubr.f32.vlgmr.msra.gmra.mrb[14].mxu0 %v1910_v20  ;;  %1116 = vmatmul.mubr.f32.vlgmr.msra.gmra.mrb[12].mxu1 %v1910_v20 }
 0x25f   : > { %1038 = vmatprep.mubr.f32.mxu0 %v1916_v32  ;;  %1121 = vmatprep.mubr.f32.mxu1 %v1916_v32 }
 0x262   : > { %1039 = vmatmul.mubr.f32.gmra.mrb[16].mxu0 %v1918_v36  ;;  %1122 = vmatmul.mubr.f32.gmra.mrb[14].mxu1 %v1918_v36 }
 0x263   : > { %1044 = vmatprep.mubr.f32.mxu0 %v1924_v49  ;;  %1127 = vmatprep.mubr.f32.mxu1 %v1924_v49 }
 0x266   : > { %1045 = vmatmul.mubr.f32.gmra.mrb[18].mxu0 %v1926_v53  ;;  %1128 = vmatmul.mubr.f32.gmra.mrb[16].mxu1 %v1926_v53 }
 0x2f1   : > { %v868_v20 = vpop.f32.mrb[8].mxu0  ;;  %v951_v32 = vpop.f32.mrb[6].mxu1 }
 0x2f2   : > { %1134 = vst [vmem:[%s1949_s12] sm:$0xff] %v868_v20  ;;  %1136 = vst [vmem:[%s1949_s12 + $0x10] sm:$0xff] %v951_v32  ;;  %v870_v36 = vpop.f32.mrb[9].mxu0  ;;  %v953_v49 = vpop.f32.mrb[7].mxu1 }
 0x2f3   : > { %1135 = vst [vmem:[%s1949_s12 + $0x8] sm:$0xff] %v870_v36  ;;  %1137 = vst [vmem:[%s1949_s12 + $0x18] sm:$0xff] %v953_v49 }
 0x2f5   : > { %v874_v53 = vpop.f32.mrb[10].mxu0  ;;  %v957_v24 = vpop.f32.mrb[8].mxu1 }
 0x2f6   : > { %1142 = vst [vmem:[%s1949_s12 + $0x40] sm:$0xff] %v874_v53  ;;  %1144 = vst [vmem:[%s1949_s12 + $0x50] sm:$0xff] %v957_v24  ;;  %v876_v25 = vpop.f32.mrb[11].mxu0  ;;  %v959_v26 = vpop.f32.mrb[9].mxu1 }
 0x2f7   : > { %1143 = vst [vmem:[%s1949_s12 + $0x48] sm:$0xff] %v876_v25  ;;  %1145 = vst [vmem:[%s1949_s12 + $0x58] sm:$0xff] %v959_v26 }
 0x2f9   : > { %v880_v27 = vpop.f32.mrb[12].mxu0  ;;  %v963_v28 = vpop.f32.mrb[10].mxu1 }
 0x2fa   : > { %1150 = vst [vmem:[%s1949_s12 + $0x80] sm:$0x7] %v880_v27  ;;  %1152 = vst [vmem:[%s1949_s12 + $0x90] sm:$0x7] %v963_v28  ;;  %v882_v29 = vpop.f32.mrb[13].mxu0  ;;  %v965_v30 = vpop.f32.mrb[11].mxu1 }
 0x2fb   : > { %1151 = vst [vmem:[%s1949_s12 + $0x88] sm:$0x7] %v882_v29  ;;  %1153 = vst [vmem:[%s1949_s12 + $0x98] sm:$0x7] %v965_v30 }
 0x331   : > { %v1034_v31 = vpop.f32.mrb[14].mxu0  ;;  %v1117_v33 = vpop.f32.mrb[12].mxu1 }
 0x332   : > { %1138 = vst [vmem:[%s1949_s12 + $0x20] sm:$0xff] %v1034_v31  ;;  %1140 = vst [vmem:[%s1949_s12 + $0x30] sm:$0xff] %v1117_v33  ;;  %v1036_v34 = vpop.f32.mrb[15].mxu0  ;;  %v1119_v35 = vpop.f32.mrb[13].mxu1 }
 0x333   : > { %1139 = vst [vmem:[%s1949_s12 + $0x28] sm:$0xff] %v1036_v34  ;;  %1141 = vst [vmem:[%s1949_s12 + $0x38] sm:$0xff] %v1119_v35 }
 0x335   : > { %v1040_v37 = vpop.f32.mrb[16].mxu0  ;;  %v1123_v38 = vpop.f32.mrb[14].mxu1 }
 0x336   : > { %1146 = vst [vmem:[%s1949_s12 + $0x60] sm:$0xff] %v1040_v37  ;;  %1148 = vst [vmem:[%s1949_s12 + $0x70] sm:$0xff] %v1123_v38  ;;  %v1042_v39 = vpop.f32.mrb[17].mxu0  ;;  %v1125_v40 = vpop.f32.mrb[15].mxu1 }
 0x337   : > { %1147 = vst [vmem:[%s1949_s12 + $0x68] sm:$0xff] %v1042_v39  ;;  %1149 = vst [vmem:[%s1949_s12 + $0x78] sm:$0xff] %v1125_v40 }
 0x339   : > { %v1046_v41 = vpop.f32.mrb[18].mxu0  ;;  %v1129_v42 = vpop.f32.mrb[16].mxu1 }
 0x33a   : > { %1154 = vst [vmem:[%s1949_s12 + $0xa0] sm:$0x7] %v1046_v41  ;;  %1156 = vst [vmem:[%s1949_s12 + $0xb0] sm:$0x7] %v1129_v42  ;;  %v1048_v43 = vpop.f32.mrb[19].mxu0  ;;  %v1131_v44 = vpop.f32.mrb[17].mxu1 }
 0x33b   : > { %1155 = vst [vmem:[%s1949_s12 + $0xa8] sm:$0x7] %v1048_v43  ;;  %1157 = vst [vmem:[%s1949_s12 + $0xb8] sm:$0x7] %v1131_v44 }
 0x33c PF: > { %p17_p8 = scmp.ge.s32.totalorder %s1772_s7, 4   ;;  %s2006_s21 = smov %s1675_s22 }
 0x33d   : > { %s2007_s22 = smov %s1679_s23  ;;  %s2008_s23 = smov %s1798_s28 }
 0x33e   : > { %s2009_s24 = smov %s1772_s7  ;;  %19 = sbr.rel (!%p17_p8) target bundleno = 4 (0x4), region = 88 }
 0x345   :  { %1179 = vsyncpa [#allocation3], 1 }
 0x346   :  { %1181 = vsyncpa [#allocation3 + $0x1], 1 }
 0x347   :  { %1182 = vsyncpa [#allocation5], 1 }

</bundles_post_ra>
